<compile_context>
chip_gen: v7x
topology: tpu7x:2x2x1
jax: 0.10.0
libtpu: 0.0.40
codegen_flags: <defaults>
</compile_context>

<pallas_src>
import math
import jax
import jax.numpy as jnp
from jax.experimental import pallas as pl
from jax.experimental.pallas import tpu as pltpu


def _round_up(n, m):
    return ((n + m - 1) // m) * m


def _cdiv(a, b):
    return (a + b - 1) // b


def _mlp_kernel(x_ref, w1_ref, b1_ref, w2_ref, b2_ref, o_ref):
    x = x_ref[...]
    b1 = b1_ref[...]          # bias loads hoisted once per grid step
    b2 = b2_ref[...]
    # fc1: [TB, I] @ [I, H] + [1, H]  (f32 accumulation on the MXU)
    h = jnp.dot(x, w1_ref[...], preferred_element_type=jnp.float32) + b1
    # ReLU in f32
    h = jnp.maximum(h, 0.0)
    # fc2: [TB, H] @ [H, O] + [1, O]
    y = jnp.dot(h.astype(w2_ref.dtype), w2_ref[...], preferred_element_type=jnp.float32) + b2
    o_ref[...] = y.astype(o_ref.dtype)


def mlp_forward(x, w1, b1, w2, b2, *, tb=None, vmem_budget_bytes=24 << 20):
    """x: [B, I]; w1: [I, H]; b1: [H] or [1, H]; w2: [H, O]; b2: [O] or [1, O] -> [B, O]."""
    B, I = x.shape
    H = w1.shape[1]
    O = w2.shape[1]

    b1 = b1.reshape(1, H)
    b2 = b2.reshape(1, O)

    itemsize = jnp.dtype(x.dtype).itemsize
    w_itemsize = jnp.dtype(w1.dtype).itemsize

    # VMEM-resident weight/bias footprint (pipeline allocates 2 buffers per input by default).
    resident_bytes = 2 * (I * H + H * O + H + O) * w_itemsize
    if resident_bytes > vmem_budget_bytes:
        # TODO(synk): implement tiled-K/H fallback with accumulator scratch for huge layers.
        raise NotImplementedError(
            "weights too large for the VMEM-resident strategy; tiled-K fallback not implemented"
        )

    def step_bytes(t):
        # double-buffered streamed x/out tiles + resident weights/biases
        return 2 * t * (I + O) * itemsize + resident_bytes

    if tb is None:
        # Big tiles amortize per-grid-step overhead (~0.35 µs/step).
        tb = min(2048, _round_up(B, 8))
        # Guarantee >= 2 grid steps for mid/large batches so v7x's two TCs both get work.
        if B > 256:
            tb = min(tb, _round_up(_cdiv(B, 2), 8))
        # Respect the VMEM budget (matters when feature dims grow).
        while tb > 8 and step_bytes(tb) > vmem_budget_bytes:
            tb = max(8, _round_up(tb // 2, 8))
    tb = max(8, _round_up(tb, 8))

    B_p = _round_up(B, tb)
    x_p = x if B_p == B else jnp.pad(x, ((0, B_p - B), (0, 0)))

    grid = (B_p // tb,)

    # Right-size the scoped-VMEM limit from the real footprint (with headroom), instead of a
    # blanket 48 MiB; keeps compiler scratch headroom on v7x's 64 MiB VMEM.
    vmem_limit = int(min(max(2 * step_bytes(tb) + (4 << 20), 16 << 20), 48 << 20))

    cost = pl.CostEstimate(
        flops=2 * B_p * H * (I + O),
        transcendentals=0,
        bytes_accessed=B_p * (I + O) * itemsize + (I * H + H * O + H + O) * w_itemsize,
    )

    out = pl.pallas_call(
        _mlp_kernel,
        out_shape=jax.ShapeDtypeStruct((B_p, O), x.dtype),
        grid=grid,
        in_specs=[
            # x tile: streamed & double-buffered; last dim equals the full array dim (legal
            # even when I is not a multiple of 128), so no feature padding pass is needed.
            pl.BlockSpec((tb, I), lambda i: (i, 0)),
            pl.BlockSpec((I, H), lambda i: (0, 0)),    # w1: VMEM-resident
            pl.BlockSpec((1, H), lambda i: (0, 0)),    # b1: VMEM-resident
            pl.BlockSpec((H, O), lambda i: (0, 0)),    # w2: VMEM-resident
            pl.BlockSpec((1, O), lambda i: (0, 0)),    # b2: VMEM-resident
        ],
        # Unpadded (tb, O) output block: for tiny O a masked store beats an 8x-inflated
        # lane-dense write plus a post-kernel slice pass.
        out_specs=pl.BlockSpec((tb, O), lambda i: (i, 0)),
        compiler_params=pltpu.CompilerParams(
            dimension_semantics=("parallel",),         # batch axis is independent
            vmem_limit_bytes=vmem_limit,
        ),
        cost_estimate=cost,
    )(x_p, w1, b1, w2, b2)

    return out if B_p == B else out[:B]


def init_params(key, input_size, hidden_size, output_size, dtype=jnp.float32):
    """Deterministic init matching torch.nn.Linear default (U(-1/sqrt(fan_in), 1/sqrt(fan_in)))."""
    k1, k2, k3, k4 = jax.random.split(key, 4)
    bound1 = 1.0 / math.sqrt(input_size)
    bound2 = 1.0 / math.sqrt(hidden_size)
    w1 = jax.random.uniform(k1, (input_size, hidden_size), jnp.float32, -bound1, bound1).astype(dtype)
    b1 = jax.random.uniform(k2, (1, hidden_size), jnp.float32, -bound1, bound1).astype(dtype)
    w2 = jax.random.uniform(k3, (hidden_size, output_size), jnp.float32, -bound2, bound2).astype(dtype)
    b2 = jax.random.uniform(k4, (1, output_size), jnp.float32, -bound2, bound2).astype(dtype)
    return w1, b1, w2, b2


def reference_forward(x, w1, b1, w2, b2):
    h = jnp.maximum(x @ w1 + b1, 0.0)
    return h @ w2 + b2


if __name__ == "__main__":
    key = jax.random.PRNGKey(0)
    kx, kp, kx2, kx3 = jax.random.split(key, 4)

    batch = 8
    input_size = 32
    hidden_size = 64
    output_size = 16

    x = jax.random.normal(kx, (batch, input_size), jnp.float32)
    w1, b1, w2, b2 = init_params(kp, input_size, hidden_size, output_size)

    out = jax.block_until_ready(mlp_forward(x, w1, b1, w2, b2))
    ref = reference_forward(x, w1, b1, w2, b2)
    assert out.shape == (batch, output_size)
    assert jnp.allclose(out, ref, atol=1e-5, rtol=1e-5), "mismatch vs reference (small batch)"

    # Non-aligned batch, auto tile selection -> >= 2 grid steps (exercises tiling + batch pad).
    batch2 = 300
    x2 = jax.random.normal(kx2, (batch2, input_size), jnp.float32)
    out2 = jax.block_until_ready(mlp_forward(x2, w1, b1, w2, b2))
    ref2 = reference_forward(x2, w1, b1, w2, b2)
    assert out2.shape == (batch2, output_size)
    assert jnp.allclose(out2, ref2, atol=1e-5, rtol=1e-5), "mismatch vs reference (tiled batch)"

    # bf16 storage path (v6e/v7x bandwidth win); MXU accumulation stays f32 in the kernel.
    batch3 = 512
    x3 = jax.random.normal(kx3, (batch3, input_size), jnp.float32).astype(jnp.bfloat16)
    w1b, b1b, w2b, b2b = (p.astype(jnp.bfloat16) for p in (w1, b1, w2, b2))
    out3 = jax.block_until_ready(mlp_forward(x3, w1b, b1b, w2b, b2b))
    ref3 = reference_forward(
        x3.astype(jnp.float32), w1b.astype(jnp.float32), b1b.astype(jnp.float32),
        w2b.astype(jnp.float32), b2b.astype(jnp.float32))
    assert out3.shape == (batch3, output_size)
    assert jnp.allclose(out3.astype(jnp.float32), ref3, atol=1e-1, rtol=1e-1), \
        "mismatch vs reference (bf16 path)"

    print("KERNEL_OK")
</pallas_src>

<mosaic_0001>
module attributes {stable_mosaic.version = 11 : i64} {
  func.func @_mlp_kernel(%arg0: i32, %arg1: memref<8x32xf32, #tpu.memory_space<vmem>>, %arg2: memref<32x64xf32, #tpu.memory_space<vmem>>, %arg3: memref<1x64xf32, #tpu.memory_space<vmem>>, %arg4: memref<64x16xf32, #tpu.memory_space<vmem>>, %arg5: memref<1x16xf32, #tpu.memory_space<vmem>>, %arg6: memref<8x16xf32, #tpu.memory_space<vmem>>) attributes {dimension_semantics = [#tpu.dimension_semantics<parallel>], iteration_bounds = array<i64: 1>, scalar_prefetch = 0 : i64, scratch_operands = 0 : i64, tpu.core_type = #tpu.core_type<tc>, window_params = [{transform_indices = @transform_0, window_bounds = array<i64: 8, 32>}, {pipeline_mode = #tpu.pipeline_mode<synchronous>, transform_indices = @transform_1, window_bounds = array<i64: 32, 64>}, {pipeline_mode = #tpu.pipeline_mode<synchronous>, transform_indices = @transform_2, window_bounds = array<i64: 1, 64>}, {pipeline_mode = #tpu.pipeline_mode<synchronous>, transform_indices = @transform_3, window_bounds = array<i64: 64, 16>}, {pipeline_mode = #tpu.pipeline_mode<synchronous>, transform_indices = @transform_4, window_bounds = array<i64: 1, 16>}, {transform_indices = @transform_5, window_bounds = array<i64: 8, 16>}]} {
    %c0 = arith.constant 0 : index
    %c0_0 = arith.constant 0 : index
    %0 = vector.load %arg1[%c0, %c0_0] : memref<8x32xf32, #tpu.memory_space<vmem>>, vector<8x32xf32>
    %c0_1 = arith.constant 0 : index
    %c0_2 = arith.constant 0 : index
    %1 = vector.load %arg3[%c0_1, %c0_2] : memref<1x64xf32, #tpu.memory_space<vmem>>, vector<1x64xf32>
    %c0_3 = arith.constant 0 : index
    %c0_4 = arith.constant 0 : index
    %2 = vector.load %arg5[%c0_3, %c0_4] : memref<1x16xf32, #tpu.memory_space<vmem>>, vector<1x16xf32>
    %c0_5 = arith.constant 0 : index
    %c0_6 = arith.constant 0 : index
    %3 = vector.load %arg2[%c0_5, %c0_6] : memref<32x64xf32, #tpu.memory_space<vmem>>, vector<32x64xf32>
    %cst = arith.constant dense<0.000000e+00> : vector<8x64xf32>
    %4 = tpu.matmul %0, %3, %cst {dimension_numbers = #tpu.dot_dimension_numbers<[1], [0], [0], [1], [0, 0, 1, 1], [], []>} : vector<8x32xf32>, vector<32x64xf32>, vector<8x64xf32> -> vector<8x64xf32>
    %5 = vector.broadcast %1 : vector<1x64xf32> to vector<8x64xf32>
    %6 = arith.addf %4, %5 : vector<8x64xf32>
    %cst_7 = arith.constant 0.000000e+00 : f32
    %7 = vector.broadcast %cst_7 : f32 to vector<8x64xf32>
    %8 = arith.maximumf %6, %7 : vector<8x64xf32>
    %c0_8 = arith.constant 0 : index
    %c0_9 = arith.constant 0 : index
    %9 = vector.load %arg4[%c0_8, %c0_9] : memref<64x16xf32, #tpu.memory_space<vmem>>, vector<64x16xf32>
    %cst_10 = arith.constant dense<0.000000e+00> : vector<8x16xf32>
    %10 = tpu.matmul %8, %9, %cst_10 {dimension_numbers = #tpu.dot_dimension_numbers<[1], [0], [0], [1], [0, 0, 1, 1], [], []>} : vector<8x64xf32>, vector<64x16xf32>, vector<8x16xf32> -> vector<8x16xf32>
    %11 = vector.broadcast %2 : vector<1x16xf32> to vector<8x16xf32>
    %12 = arith.addf %10, %11 : vector<8x16xf32>
    %c0_11 = arith.constant 0 : index
    %c0_12 = arith.constant 0 : index
    %13 = vector.load %arg6[%c0_11, %c0_12] : memref<8x16xf32, #tpu.memory_space<vmem>>, vector<8x16xf32>
    tpu.vector_store %arg6[%c0_11, %c0_12], %12 {strides = array<i32>} : memref<8x16xf32, #tpu.memory_space<vmem>>, vector<8x16xf32>,
    return
  }
  func.func @transform_0(%arg0: i32) -> (i32, i32) {
    %c0_i32 = arith.constant 0 : i32
    %c0_i32_0 = arith.constant 0 : i32
    return %arg0, %c0_i32 : i32, i32
  }
  func.func @transform_1(%arg0: i32) -> (i32, i32) {
    %c0_i32 = arith.constant 0 : i32
    %c0_i32_0 = arith.constant 0 : i32
    %c0_i32_1 = arith.constant 0 : i32
    return %c0_i32, %c0_i32_0 : i32, i32
  }
  func.func @transform_2(%arg0: i32) -> (i32, i32) {
    %c0_i32 = arith.constant 0 : i32
    %c0_i32_0 = arith.constant 0 : i32
    %c0_i32_1 = arith.constant 0 : i32
    return %c0_i32, %c0_i32_0 : i32, i32
  }
  func.func @transform_3(%arg0: i32) -> (i32, i32) {
    %c0_i32 = arith.constant 0 : i32
    %c0_i32_0 = arith.constant 0 : i32
    %c0_i32_1 = arith.constant 0 : i32
    return %c0_i32, %c0_i32_0 : i32, i32
  }
  func.func @transform_4(%arg0: i32) -> (i32, i32) {
    %c0_i32 = arith.constant 0 : i32
    %c0_i32_0 = arith.constant 0 : i32
    %c0_i32_1 = arith.constant 0 : i32
    return %c0_i32, %c0_i32_0 : i32, i32
  }
  func.func @transform_5(%arg0: i32) -> (i32, i32) {
    %c0_i32 = arith.constant 0 : i32
    %c0_i32_0 = arith.constant 0 : i32
    return %arg0, %c0_i32 : i32, i32
  }
}

</mosaic_0001>

<bundles_post_ra>
// kernel: tpu_custom_call.1
= control target key start
LH: loop header
LB: loop body
LE: loop exit
PB: predicated region body
PF: predicated region fallthrough
CT: control target
= control target key end

     0   :  { %v307_v3 = vmov 0.0|0.0   ;;  %vm308_vm0 = vmmov 0   ;;  %v309_v6 = vmov 0.0   ;;  %s398_s0 = inlined_call_operand.vmem [shape: f32[8,32], index: 0, kind: input, shape index: {}]   ;;  %s399_s1 = inlined_call_operand.vmem [shape: f32[32,64], index: 1, kind: input, shape index: {}]   ;;  %s400_s2 = inlined_call_operand.vmem [shape: f32[1,64], index: 2, kind: input, shape index: {}]   ;;  %s401_s3 = inlined_call_operand.vmem [shape: f32[64,16], index: 3, kind: input, shape index: {}]   ;;  %s402_s4 = inlined_call_operand.vmem [shape: f32[1,16], index: 4, kind: input, shape index: {}]   ;;  %s403_s5 = inlined_call_operand.hbm [shape: f32[8,16], index: 5, kind: output, shape index: {}]  }
   0x1   :  { %v24_v0 = vld [vmem:[%s399_s1] sm:$0xff]  ;;  %v25_v1 = vld [vmem:[%s399_s1 + $0x8] sm:$0xff]  ;;  %v26_v2 = vld [vmem:[%s399_s1 + $0x10] sm:$0xff]  ;;  %261 = vmatprep.subr.bf16.mxu0 %v307_v3  ;;  %239 = vmatprep.mubr.msk.f32.mxu0 %vm308_vm0, %v309_v6 }
   0x2   :  { %v262_v4 = vpack.c.bf16 %v25_v1, %v24_v0  ;;  %v27_v5 = vld [vmem:[%s399_s1 + $0x18] sm:$0xff]  ;;  %v109_v7 = vld [vmem:[%s401_s3] sm:$0xff]  ;;  %267 = vmatprep.subr.bf16.mxu1 %v307_v3  ;;  %v110_v8 = vld [vmem:[%s401_s3 + $0x8] sm:$0xff]  ;;  %258 = vmatprep.mubr.msk.f32.mxu1 %vm308_vm0, %v309_v6 }
   0x3   :  { %v111_v9 = vld [vmem:[%s401_s3 + $0x10] sm:$0xff]  ;;  %v112_v10 = vld [vmem:[%s401_s3 + $0x18] sm:$0xff]  ;;  %v265_v11 = vpack.c.bf16 %v27_v5, %v26_v2  ;;  %v268_v12 = vpack.c.bf16 %v110_v8, %v109_v7 }
   0x4   :  { %263 = vmatpush3.bf16.msra.mxu0 %v262_v4 }
   0x5   :  { %264 = vmatprep.subr.bf16.mxu0 %v307_v3 }
   0x6   :  { %10 = vsyncpa [#allocation3], 0  ;;  %269 = vmatpush3.bf16.msra.mxu1 %v268_v12  ;;  %v271_v13 = vpack.c.bf16 %v112_v10, %v111_v9  ;;  %v113_v14 = vld [vmem:[%s401_s3 + $0x20] sm:$0xff]  ;;  %v114_v15 = vld [vmem:[%s401_s3 + $0x28] sm:$0xff]  ;;  %vm34_vm1 = vcmask 261120   ;;  %vm123_vm2 = vcmask 523264  }
   0x7   :  { %270 = vmatprep.subr.bf16.mxu1 %v307_v3  ;;  %v21_v16 = vld [vmem:[%s398_s0] sm:$0xff]  ;;  %v274_v17 = vpack.c.bf16 %v114_v15, %v113_v14  ;;  %v115_v18 = vld [vmem:[%s401_s3 + $0x30] sm:$0xff]  ;;  %v116_v19 = vld [vmem:[%s401_s3 + $0x38] sm:$0xff]  ;;  %s310_s21 = smov [#allocation2]   ;;  %vm197_vm3 = vcmask 130048  }
   0x8   :  { %266 = vmatpush3.bf16.msra.mxu0 %v265_v11  ;;  %v277_v20 = vpack.c.bf16 %v116_v19, %v115_v18  ;;  %v213_v21 = vld [vmem:[%s400_s2] ss:$0 sm:$0xff]  ;;  %s205_s22 = sshll.u32 %s310_s21, 4  ;;  %s206_s22 = int_to_ptr.vmem [resolvable:$true] %s205_s22 }
   0x9   :  { %v215_v26 = vld [vmem:[%s402_s4] ss:$0 sm:$0xff]  ;;  %s283_s3 = scalar_lea.vmem %s206_s22, 128  ;;  %p288_p1 = scmp.lt.s32.totalorder %s206_s22, %s206_s22 }
   0xa   :  { %272 = vmatpush3.bf16.msra.mxu1 %v271_v13  ;;  %p284_p0 = scmp.ne.s32.totalorder %s206_s22, %s283_s3  ;;  %p289_p2 = scmp.lt.s32.totalorder %s283_s3, %s283_s3 }
   0xb   :  { %240 = vmatmul.mubr.msk.f32.vlgmr.msra.gmra.mrb[0].mxu0 %vm34_vm1, %v21_v16  ;;  %273 = vmatprep.subr.bf16.mxu1 %v307_v3 }
   0xc   :  { %p290_p3 = por %p289_p2, %p288_p1 }
   0xe   :  { %275 = vmatpush3.bf16.msra.mxu1 %v274_v17  ;;  %p291_p4 = pnand %p290_p3, %p284_p0 }
   0xf   :  { %276 = vmatprep.subr.bf16.mxu1 %v307_v3 }
  0x12   :  { %278 = vmatpush3.bf16.msra.mxu1 %v277_v20 }
  0xde   :  { %v104_v22 = vpop.f32.mrb[0].mxu0 }
  0xdf   :  { %v105_v23 = vadd.f32 %v213_v21, %v104_v22  ;;  %v241_v24 = vpop.f32.mrb[1].mxu0 }
  0xe1   :  { %v108_v25 = vmax.f32 %v105_v23, 0.0 }
  0xe3   :  { %259 = vmatmul.mubr.msk.f32.vlgmr.msra.gmra.mrb[0].mxu1 %vm123_vm2, %v108_v25 }
 0x1b6   :  { %v193_v27 = vpop.f32.mrb[0].mxu1 }
 0x1b7   :  { %v194_v28 = vadd.f32 %v215_v26, %v193_v27  ;;  %v260_v29 = vpop.f32.mrb[1].mxu1 }
 0x1b9   :  { %198 = vst.msk [vmem:[#allocation2] sm:$0xff] %vm197_vm3, %v194_v28 }
 0x1ba   :  { %294 = shalt.err (!%p291_p4)
}
 0x1bb   :  { %s295_s24 = scalar_lea.hbm %s403_s5, 128 }
 0x1bc   :  { %p296_p5 = scmp.ne.s32.totalorder %s403_s5, %s295_s24  ;;  %p299_p6 = scmp.lt.u32.totalorder %s295_s24, %s403_s5 }
 0x1be   :  { %p301_p7 = pnand %p299_p6, %p296_p5 }
 0x1c0   :  { %304 = shalt.err (!%p301_p7)
}
 0x1c1   :  { %208 = dma.vmem_to_hbm [thread:$0]  %s206_s22, 128, %s403_s5, [#allocation3]  }
 0x1c2   :  { %305 = dma.done.wait [#allocation3], 128  }
 0x1c3   :  { %306 = vsyncadd [#allocation3], 4294967168 }
 0x1c4   :  { %212 = vsyncpa [#allocation3], 1 }

</bundles_post_ra>
